<compile_context>
chip_gen: v5e
topology: v5e:2x2
jax: 0.10.0
libtpu: 0.0.40
codegen_flags: <defaults>
</compile_context>

<pallas_src>
import functools

import jax
import jax.numpy as jnp
from jax.experimental import pallas as pl
from jax.experimental.pallas import tpu as pltpu


# ---------------------------------------------------------------------------
# Pass 1: ChannelWeights (global avg/max pool over HW + tiny MLP -> cw0, cw1)
# ---------------------------------------------------------------------------
def _channel_weights_kernel(x1_ref, x2_ref,
                            w1a1_ref, w1a2_ref, w1m1_ref, w1m2_ref, b1_ref,
                            w2a_ref, w2b_ref, b2a_ref, b2b_ref,
                            cw0_ref, cw1_ref,
                            sum1_sc, sum2_sc, max1_sc, max2_sc,
                            *, inv_hw):
    t = pl.program_id(1)

    @pl.when(t == 0)
    def _init():
        sum1_sc[...] = jnp.zeros_like(sum1_sc)
        sum2_sc[...] = jnp.zeros_like(sum2_sc)
        max1_sc[...] = jnp.full_like(max1_sc, -jnp.inf)
        max2_sc[...] = jnp.full_like(max2_sc, -jnp.inf)

    x1 = x1_ref[0]                       # (C, T): channels on sublanes, pixels on lanes
    x2 = x2_ref[0]
    sum1_sc[...] += jnp.sum(x1, axis=1, keepdims=True)
    sum2_sc[...] += jnp.sum(x2, axis=1, keepdims=True)
    max1_sc[...] = jnp.maximum(max1_sc[...], jnp.max(x1, axis=1, keepdims=True))
    max2_sc[...] = jnp.maximum(max2_sc[...], jnp.max(x2, axis=1, keepdims=True))

    @pl.when(t == pl.num_programs(1) - 1)
    def _finalize():
        avg1 = sum1_sc[...] * inv_hw     # (C, 1)
        avg2 = sum2_sc[...] * inv_hw
        # y = [avg1, avg2, max1, max2]; the concat is expressed as a split-sum
        # against pre-split (hid_c, C) weight blocks, so no lane concatenation.
        h = (jnp.dot(w1a1_ref[...], avg1, preferred_element_type=jnp.float32)
             + jnp.dot(w1a2_ref[...], avg2, preferred_element_type=jnp.float32)
             + jnp.dot(w1m1_ref[...], max1_sc[...], preferred_element_type=jnp.float32)
             + jnp.dot(w1m2_ref[...], max2_sc[...], preferred_element_type=jnp.float32)
             + b1_ref[...])              # (hid_c, 1)
        h = jnp.maximum(h, 0.0)          # ReLU
        z0 = jax.nn.sigmoid(
            jnp.dot(w2a_ref[...], h, preferred_element_type=jnp.float32)
            + b2a_ref[...])              # (C, 1)  == channel_weights[0]
        z1 = jax.nn.sigmoid(
            jnp.dot(w2b_ref[...], h, preferred_element_type=jnp.float32)
            + b2b_ref[...])              # (C, 1)  == channel_weights[1]
        cw0_ref[0] = z0
        cw1_ref[0] = z1


# ---------------------------------------------------------------------------
# Pass 2: SpatialWeights (1x1 convs) + rectify, tiled over HW
# ---------------------------------------------------------------------------
def _spatial_rectify_kernel(x1_ref, x2_ref, cw0_ref, cw1_ref,
                            wc1a_ref, wc1b_ref, bc1_ref,
                            wc2a_ref, wc2b_ref, bc2a_ref, bc2b_ref,
                            o1_ref, o2_ref, *, lambda_c, lambda_s):
    x1 = x1_ref[0]                       # (C, T)
    x2 = x2_ref[0]
    # conv1 (1x1): (hid_s, 2C) @ (2C, T) done as split-sum over pre-split weights
    hs = (jnp.dot(wc1a_ref[...], x1, preferred_element_type=jnp.float32)
          + jnp.dot(wc1b_ref[...], x2, preferred_element_type=jnp.float32)
          + bc1_ref[...])                # (hid_s, T)
    hs = jnp.maximum(hs, 0.0)            # ReLU
    # conv2 (1x1): two (1, hid_s) rows -> lane-dense (1, T) spatial weights
    s0 = jax.nn.sigmoid(
        jnp.dot(wc2a_ref[...], hs, preferred_element_type=jnp.float32)
        + bc2a_ref[...])                 # (1, T)  == spatial_weights[0]
    s1 = jax.nn.sigmoid(
        jnp.dot(wc2b_ref[...], hs, preferred_element_type=jnp.float32)
        + bc2b_ref[...])                 # (1, T)  == spatial_weights[1]

    cw0 = cw0_ref[0]                     # (C, 1) broadcast over lanes
    cw1 = cw1_ref[0]

    o1 = x1 + lambda_c * (cw1 * x2) + lambda_s * (s1 * x2)
    o2 = x2 + lambda_c * (cw0 * x1) + lambda_s * (s0 * x1)
    o1_ref[0] = o1.astype(o1_ref.dtype)
    o2_ref[0] = o2.astype(o2_ref.dtype)


# ---------------------------------------------------------------------------
# Wrapper
# ---------------------------------------------------------------------------
def _pick_hw_tile(hw, max_tile=2048):
    """Largest multiple of 128 that divides hw (<= max_tile); else the full hw."""
    best = None
    t = 128
    while t <= min(hw, max_tile):
        if hw % t == 0:
            best = t
        t += 128
    return best if best is not None else hw


def feature_rectify(x1, x2, params, lambda_c=0.5, lambda_s=0.5):
    """x1, x2: NCHW float32.  Returns (out_x1, out_x2) in NCHW."""
    B, C, H, W = x1.shape
    HW = H * W
    # Keep NCHW: (B, C, HW) is a free reshape (no transpose / extra HBM pass).
    x1r = x1.reshape(B, C, HW)
    x2r = x2.reshape(B, C, HW)

    T = _pick_hw_tile(HW)
    n_t = HW // T

    # ---- host-side weight prep (tiny): split/transpose so kernels never
    #      slice loaded values ----
    w1 = params["w1"]                     # (4C, hid_c), (in, out)
    hid_c = w1.shape[1]
    w1a1 = w1[0 * C:1 * C, :].T           # (hid_c, C)  acts on avg1
    w1a2 = w1[1 * C:2 * C, :].T           # (hid_c, C)  acts on avg2
    w1m1 = w1[2 * C:3 * C, :].T           # (hid_c, C)  acts on max1
    w1m2 = w1[3 * C:4 * C, :].T           # (hid_c, C)  acts on max2
    b1c = params["b1"].reshape(hid_c, 1)

    w2 = params["w2"]                     # (hid_c, 2C)
    w2a = w2[:, 0:C].T                    # (C, hid_c) -> channel_weights[0]
    w2b = w2[:, C:2 * C].T                # (C, hid_c) -> channel_weights[1]
    b2 = params["b2"].reshape(2 * C)
    b2a = b2[0:C].reshape(C, 1)
    b2b = b2[C:2 * C].reshape(C, 1)

    wc1 = params["wc1"]                   # (2C, hid_s)
    hid_s = wc1.shape[1]
    wc1a = wc1[0:C, :].T                  # (hid_s, C)  acts on x1
    wc1b = wc1[C:2 * C, :].T              # (hid_s, C)  acts on x2
    bc1c = params["bc1"].reshape(hid_s, 1)

    wc2 = params["wc2"]                   # (hid_s, 2)
    wc2a = wc2[:, 0:1].T                  # (1, hid_s) -> spatial_weights[0]
    wc2b = wc2[:, 1:2].T                  # (1, hid_s) -> spatial_weights[1]
    bc2 = params["bc2"].reshape(2)
    bc2a = bc2[0:1].reshape(1, 1)
    bc2b = bc2[1:2].reshape(1, 1)

    img_tile = pl.BlockSpec((1, C, T), lambda b, t: (b, 0, t))
    cw_spec = pl.BlockSpec((1, C, 1), lambda b, t: (b, 0, 0))

    def const2d(shape):
        return pl.BlockSpec(shape, lambda b, t: (0, 0))

    # ---- Pass 1: channel weights ----
    cw0, cw1 = pl.pallas_call(
        functools.partial(_channel_weights_kernel, inv_hw=1.0 / HW),
        out_shape=(jax.ShapeDtypeStruct((B, C, 1), jnp.float32),
                   jax.ShapeDtypeStruct((B, C, 1), jnp.float32)),
        grid_spec=pltpu.PrefetchScalarGridSpec(
            num_scalar_prefetch=0,
            grid=(B, n_t),
            in_specs=[
                img_tile, img_tile,
                const2d((hid_c, C)), const2d((hid_c, C)),
                const2d((hid_c, C)), const2d((hid_c, C)),
                const2d((hid_c, 1)),
                const2d((C, hid_c)), const2d((C, hid_c)),
                const2d((C, 1)), const2d((C, 1)),
            ],
            out_specs=[cw_spec, cw_spec],
            scratch_shapes=[pltpu.VMEM((C, 1), jnp.float32)] * 4,
        ),
        compiler_params=pltpu.CompilerParams(
            dimension_semantics=("parallel", "arbitrary")),
    )(x1r, x2r, w1a1, w1a2, w1m1, w1m2, b1c, w2a, w2b, b2a, b2b)

    # ---- Pass 2: spatial weights + rectify (both grid axes independent) ----
    o1, o2 = pl.pallas_call(
        functools.partial(_spatial_rectify_kernel,
                          lambda_c=lambda_c, lambda_s=lambda_s),
        out_shape=(jax.ShapeDtypeStruct((B, C, HW), x1.dtype),
                   jax.ShapeDtypeStruct((B, C, HW), x1.dtype)),
        grid_spec=pltpu.PrefetchScalarGridSpec(
            num_scalar_prefetch=0,
            grid=(B, n_t),
            in_specs=[
                img_tile, img_tile, cw_spec, cw_spec,
                const2d((hid_s, C)), const2d((hid_s, C)), const2d((hid_s, 1)),
                const2d((1, hid_s)), const2d((1, hid_s)),
                const2d((1, 1)), const2d((1, 1)),
            ],
            out_specs=[img_tile, img_tile],
        ),
        compiler_params=pltpu.CompilerParams(
            dimension_semantics=("parallel", "parallel")),
    )(x1r, x2r, cw0, cw1, wc1a, wc1b, bc1c, wc2a, wc2b, bc2a, bc2b)

    return o1.reshape(B, C, H, W), o2.reshape(B, C, H, W)


# ---------------------------------------------------------------------------
# Pure-JAX reference (mirrors the PyTorch module, NCHW)
# ---------------------------------------------------------------------------
def feature_rectify_ref(x1, x2, params, lambda_c=0.5, lambda_s=0.5):
    B, C, H, W = x1.shape
    xcat = jnp.concatenate([x1, x2], axis=1)                # (B, 2C, H, W)
    avg = jnp.mean(xcat, axis=(2, 3))                       # (B, 2C)
    mx = jnp.max(xcat, axis=(2, 3))                         # (B, 2C)
    y = jnp.concatenate([avg, mx], axis=1)                  # (B, 4C)
    h = jax.nn.relu(y @ params["w1"] + params["b1"])
    z = jax.nn.sigmoid(h @ params["w2"] + params["b2"])     # (B, 2C)
    cw = z.reshape(B, 2, C, 1, 1).transpose(1, 0, 2, 3, 4)  # (2, B, C, 1, 1)

    xc = xcat.transpose(0, 2, 3, 1).reshape(B, H * W, 2 * C)
    hs = jax.nn.relu(xc @ params["wc1"] + params["bc1"])
    s = jax.nn.sigmoid(hs @ params["wc2"] + params["bc2"])  # (B, HW, 2)
    sw = s.reshape(B, H, W, 2).transpose(3, 0, 1, 2)[:, :, None]  # (2, B, 1, H, W)

    out1 = x1 + lambda_c * cw[1] * x2 + lambda_s * sw[1] * x2
    out2 = x2 + lambda_c * cw[0] * x1 + lambda_s * sw[0] * x1
    return out1, out2


def init_params(dim, reduction=1, seed=42):
    """Deterministic synthetic parameters (shapes match the PyTorch module)."""
    hid_c = dim * 4 // reduction
    hid_s = dim // reduction
    keys = jax.random.split(jax.random.PRNGKey(seed), 8)
    scale = 0.1
    return {
        "w1": scale * jax.random.normal(keys[0], (dim * 4, hid_c), jnp.float32),
        "b1": scale * jax.random.normal(keys[1], (1, hid_c), jnp.float32),
        "w2": scale * jax.random.normal(keys[2], (hid_c, dim * 2), jnp.float32),
        "b2": scale * jax.random.normal(keys[3], (1, dim * 2), jnp.float32),
        "wc1": scale * jax.random.normal(keys[4], (dim * 2, hid_s), jnp.float32),
        "bc1": scale * jax.random.normal(keys[5], (1, hid_s), jnp.float32),
        "wc2": scale * jax.random.normal(keys[6], (hid_s, 2), jnp.float32),
        "bc2": scale * jax.random.normal(keys[7], (1, 2), jnp.float32),
    }


if __name__ == "__main__":
    B, C, H, W = 2, 4, 16, 16
    key = jax.random.PRNGKey(0)
    k1, k2 = jax.random.split(key)
    x1 = jax.random.normal(k1, (B, C, H, W), jnp.float32)
    x2 = jax.random.normal(k2, (B, C, H, W), jnp.float32)

    params = init_params(C, reduction=1)

    frm = jax.jit(feature_rectify)
    out1, out2 = frm(x1, x2, params)
    jax.block_until_ready((out1, out2))

    ref1, ref2 = feature_rectify_ref(x1, x2, params)
    assert out1.shape == (B, C, H, W) and out2.shape == (B, C, H, W)
    assert jnp.allclose(out1, ref1, atol=1e-4, rtol=1e-4)
    assert jnp.allclose(out2, ref2, atol=1e-4, rtol=1e-4)

    print("KERNEL_OK")
</pallas_src>

<mosaic_0001>
module attributes {stable_mosaic.version = 11 : i64} {
  func.func @_channel_weights_kernel(%arg0: i32, %arg1: i32, %arg2: memref<1x4x256xf32, #tpu.memory_space<vmem>>, %arg3: memref<1x4x256xf32, #tpu.memory_space<vmem>>, %arg4: memref<16x4xf32, #tpu.memory_space<vmem>>, %arg5: memref<16x4xf32, #tpu.memory_space<vmem>>, %arg6: memref<16x4xf32, #tpu.memory_space<vmem>>, %arg7: memref<16x4xf32, #tpu.memory_space<vmem>>, %arg8: memref<16x1xf32, #tpu.memory_space<vmem>>, %arg9: memref<4x16xf32, #tpu.memory_space<vmem>>, %arg10: memref<4x16xf32, #tpu.memory_space<vmem>>, %arg11: memref<4x1xf32, #tpu.memory_space<vmem>>, %arg12: memref<4x1xf32, #tpu.memory_space<vmem>>, %arg13: memref<1x4x1xf32, #tpu.memory_space<vmem>>, %arg14: memref<1x4x1xf32, #tpu.memory_space<vmem>>, %arg15: memref<4x1xf32, #tpu.memory_space<vmem>>, %arg16: memref<4x1xf32, #tpu.memory_space<vmem>>, %arg17: memref<4x1xf32, #tpu.memory_space<vmem>>, %arg18: memref<4x1xf32, #tpu.memory_space<vmem>>) attributes {dimension_semantics = [#tpu.dimension_semantics<parallel>, #tpu.dimension_semantics<arbitrary>], iteration_bounds = array<i64: 2, 1>, scalar_prefetch = 0 : i64, scratch_operands = 4 : i64, tpu.core_type = #tpu.core_type<tc>, window_params = [{transform_indices = @transform_0, window_bounds = array<i64: 1, 4, 256>}, {transform_indices = @transform_1, window_bounds = array<i64: 1, 4, 256>}, {pipeline_mode = #tpu.pipeline_mode<synchronous>, transform_indices = @transform_2, window_bounds = array<i64: 16, 4>}, {pipeline_mode = #tpu.pipeline_mode<synchronous>, transform_indices = @transform_3, window_bounds = array<i64: 16, 4>}, {pipeline_mode = #tpu.pipeline_mode<synchronous>, transform_indices = @transform_4, window_bounds = array<i64: 16, 4>}, {pipeline_mode = #tpu.pipeline_mode<synchronous>, transform_indices = @transform_5, window_bounds = array<i64: 16, 4>}, {pipeline_mode = #tpu.pipeline_mode<synchronous>, transform_indices = @transform_6, window_bounds = array<i64: 16, 1>}, {pipeline_mode = #tpu.pipeline_mode<synchronous>, transform_indices = @transform_7, window_bounds = array<i64: 4, 16>}, {pipeline_mode = #tpu.pipeline_mode<synchronous>, transform_indices = @transform_8, window_bounds = array<i64: 4, 16>}, {pipeline_mode = #tpu.pipeline_mode<synchronous>, transform_indices = @transform_9, window_bounds = array<i64: 4, 1>}, {pipeline_mode = #tpu.pipeline_mode<synchronous>, transform_indices = @transform_10, window_bounds = array<i64: 4, 1>}, {transform_indices = @transform_11, window_bounds = array<i64: 1, 4, 1>}, {transform_indices = @transform_12, window_bounds = array<i64: 1, 4, 1>}]} {
    %c0_i32 = arith.constant 0 : i32
    %0 = arith.cmpi eq, %arg1, %c0_i32 : i32
    %1 = arith.extui %0 : i1 to i32
    %c0_i32_0 = arith.constant 0 : i32
    %2 = arith.cmpi ne, %1, %c0_i32_0 : i32
    scf.if %2 {
      %cst_27 = arith.constant 0.000000e+00 : f32
      %30 = vector.broadcast %cst_27 : f32 to vector<4x1xf32>
      %c0_28 = arith.constant 0 : index
      %c0_29 = arith.constant 0 : index
      %31 = vector.load %arg15[%c0_28, %c0_29] : memref<4x1xf32, #tpu.memory_space<vmem>>, vector<4x1xf32>
      tpu.vector_store %arg15[%c0_28, %c0_29], %30 {strides = array<i32>} : memref<4x1xf32, #tpu.memory_space<vmem>>, vector<4x1xf32>,
      %cst_30 = arith.constant 0.000000e+00 : f32
      %32 = vector.broadcast %cst_30 : f32 to vector<4x1xf32>
      %c0_31 = arith.constant 0 : index
      %c0_32 = arith.constant 0 : index
      %33 = vector.load %arg16[%c0_31, %c0_32] : memref<4x1xf32, #tpu.memory_space<vmem>>, vector<4x1xf32>
      tpu.vector_store %arg16[%c0_31, %c0_32], %32 {strides = array<i32>} : memref<4x1xf32, #tpu.memory_space<vmem>>, vector<4x1xf32>,
      %cst_33 = arith.constant 0xFF800000 : f32
      %34 = vector.broadcast %cst_33 : f32 to vector<4x1xf32>
      %c0_34 = arith.constant 0 : index
      %c0_35 = arith.constant 0 : index
      %35 = vector.load %arg17[%c0_34, %c0_35] : memref<4x1xf32, #tpu.memory_space<vmem>>, vector<4x1xf32>
      tpu.vector_store %arg17[%c0_34, %c0_35], %34 {strides = array<i32>} : memref<4x1xf32, #tpu.memory_space<vmem>>, vector<4x1xf32>,
      %cst_36 = arith.constant 0xFF800000 : f32
      %36 = vector.broadcast %cst_36 : f32 to vector<4x1xf32>
      %c0_37 = arith.constant 0 : index
      %c0_38 = arith.constant 0 : index
      %37 = vector.load %arg18[%c0_37, %c0_38] : memref<4x1xf32, #tpu.memory_space<vmem>>, vector<4x1xf32>
      tpu.vector_store %arg18[%c0_37, %c0_38], %36 {strides = array<i32>} : memref<4x1xf32, #tpu.memory_space<vmem>>, vector<4x1xf32>,
    } else {
    }
    %c0 = arith.constant 0 : index
    %c0_1 = arith.constant 0 : index
    %c0_2 = arith.constant 0 : index
    %3 = vector.load %arg2[%c0, %c0_1, %c0_2] : memref<1x4x256xf32, #tpu.memory_space<vmem>>, vector<1x4x256xf32>
    %4 = vector.shape_cast %3 : vector<1x4x256xf32> to vector<4x256xf32>
    %c0_3 = arith.constant 0 : index
    %c0_4 = arith.constant 0 : index
    %c0_5 = arith.constant 0 : index
    %5 = vector.load %arg3[%c0_3, %c0_4, %c0_5] : memref<1x4x256xf32, #tpu.memory_space<vmem>>, vector<1x4x256xf32>
    %6 = vector.shape_cast %5 : vector<1x4x256xf32> to vector<4x256xf32>
    %c0_6 = arith.constant 0 : index
    %c0_7 = arith.constant 0 : index
    %7 = vector.load %arg15[%c0_6, %c0_7] : memref<4x1xf32, #tpu.memory_space<vmem>>, vector<4x1xf32>
    %cst = arith.constant dense<0.000000e+00> : vector<4xf32>
    %8 = vector.multi_reduction <add>, %4, %cst [1] : vector<4x256xf32> to vector<4xf32>
    %9 = vector.shape_cast %8 : vector<4xf32> to vector<4x1xf32>
    %10 = arith.addf %7, %9 : vector<4x1xf32>
    %c0_8 = arith.constant 0 : index
    %c0_9 = arith.constant 0 : index
    %11 = vector.load %arg15[%c0_8, %c0_9] : memref<4x1xf32, #tpu.memory_space<vmem>>, vector<4x1xf32>
    tpu.vector_store %arg15[%c0_8, %c0_9], %10 {strides = array<i32>} : memref<4x1xf32, #tpu.memory_space<vmem>>, vector<4x1xf32>,
    %c0_10 = arith.constant 0 : index
    %c0_11 = arith.constant 0 : index
    %12 = vector.load %arg16[%c0_10, %c0_11] : memref<4x1xf32, #tpu.memory_space<vmem>>, vector<4x1xf32>
    %cst_12 = arith.constant dense<0.000000e+00> : vector<4xf32>
    %13 = vector.multi_reduction <add>, %6, %cst_12 [1] : vector<4x256xf32> to vector<4xf32>
    %14 = vector.shape_cast %13 : vector<4xf32> to vector<4x1xf32>
    %15 = arith.addf %12, %14 : vector<4x1xf32>
    %c0_13 = arith.constant 0 : index
    %c0_14 = arith.constant 0 : index
    %16 = vector.load %arg16[%c0_13, %c0_14] : memref<4x1xf32, #tpu.memory_space<vmem>>, vector<4x1xf32>
    tpu.vector_store %arg16[%c0_13, %c0_14], %15 {strides = array<i32>} : memref<4x1xf32, #tpu.memory_space<vmem>>, vector<4x1xf32>,
    %c0_15 = arith.constant 0 : index
    %c0_16 = arith.constant 0 : index
    %17 = vector.load %arg17[%c0_15, %c0_16] : memref<4x1xf32, #tpu.memory_space<vmem>>, vector<4x1xf32>
    %cst_17 = arith.constant dense<0xFF800000> : vector<4xf32>
    %18 = vector.multi_reduction <maximumf>, %4, %cst_17 [1] : vector<4x256xf32> to vector<4xf32>
    %19 = vector.shape_cast %18 : vector<4xf32> to vector<4x1xf32>
    %20 = arith.maximumf %17, %19 : vector<4x1xf32>
    %c0_18 = arith.constant 0 : index
    %c0_19 = arith.constant 0 : index
    %21 = vector.load %arg17[%c0_18, %c0_19] : memref<4x1xf32, #tpu.memory_space<vmem>>, vector<4x1xf32>
    tpu.vector_store %arg17[%c0_18, %c0_19], %20 {strides = array<i32>} : memref<4x1xf32, #tpu.memory_space<vmem>>, vector<4x1xf32>,
    %c0_20 = arith.constant 0 : index
    %c0_21 = arith.constant 0 : index
    %22 = vector.load %arg18[%c0_20, %c0_21] : memref<4x1xf32, #tpu.memory_space<vmem>>, vector<4x1xf32>
    %cst_22 = arith.constant dense<0xFF800000> : vector<4xf32>
    %23 = vector.multi_reduction <maximumf>, %6, %cst_22 [1] : vector<4x256xf32> to vector<4xf32>
    %24 = vector.shape_cast %23 : vector<4xf32> to vector<4x1xf32>
    %25 = arith.maximumf %22, %24 : vector<4x1xf32>
    %c0_23 = arith.constant 0 : index
    %c0_24 = arith.constant 0 : index
    %26 = vector.load %arg18[%c0_23, %c0_24] : memref<4x1xf32, #tpu.memory_space<vmem>>, vector<4x1xf32>
    tpu.vector_store %arg18[%c0_23, %c0_24], %25 {strides = array<i32>} : memref<4x1xf32, #tpu.memory_space<vmem>>, vector<4x1xf32>,
    %c0_i32_25 = arith.constant 0 : i32
    %27 = arith.cmpi eq, %arg1, %c0_i32_25 : i32
    %28 = arith.extui %27 : i1 to i32
    %c0_i32_26 = arith.constant 0 : i32
    %29 = arith.cmpi ne, %28, %c0_i32_26 : i32
    scf.if %29 {
      %c0_27 = arith.constant 0 : index
      %c0_28 = arith.constant 0 : index
      %30 = vector.load %arg15[%c0_27, %c0_28] : memref<4x1xf32, #tpu.memory_space<vmem>>, vector<4x1xf32>
      %cst_29 = arith.constant 3.906250e-03 : f32
      %31 = vector.broadcast %cst_29 : f32 to vector<4x1xf32>
      %32 = arith.mulf %30, %31 : vector<4x1xf32>
      %c0_30 = arith.constant 0 : index
      %c0_31 = arith.constant 0 : index
      %33 = vector.load %arg16[%c0_30, %c0_31] : memref<4x1xf32, #tpu.memory_space<vmem>>, vector<4x1xf32>
      %cst_32 = arith.constant 3.906250e-03 : f32
      %34 = vector.broadcast %cst_32 : f32 to vector<4x1xf32>
      %35 = arith.mulf %33, %34 : vector<4x1xf32>
      %c0_33 = arith.constant 0 : index
      %c0_34 = arith.constant 0 : index
      %36 = vector.load %arg4[%c0_33, %c0_34] : memref<16x4xf32, #tpu.memory_space<vmem>>, vector<16x4xf32>
      %cst_35 = arith.constant dense<0.000000e+00> : vector<16x1xf32>
      %37 = tpu.matmul %36, %32, %cst_35 {dimension_numbers = #tpu.dot_dimension_numbers<[1], [0], [0], [1], [0, 0, 1, 1], [], []>} : vector<16x4xf32>, vector<4x1xf32>, vector<16x1xf32> -> vector<16x1xf32>
      %c0_36 = arith.constant 0 : index
      %c0_37 = arith.constant 0 : index
      %38 = vector.load %arg5[%c0_36, %c0_37] : memref<16x4xf32, #tpu.memory_space<vmem>>, vector<16x4xf32>
      %cst_38 = arith.constant dense<0.000000e+00> : vector<16x1xf32>
      %39 = tpu.matmul %38, %35, %cst_38 {dimension_numbers = #tpu.dot_dimension_numbers<[1], [0], [0], [1], [0, 0, 1, 1], [], []>} : vector<16x4xf32>, vector<4x1xf32>, vector<16x1xf32> -> vector<16x1xf32>
      %40 = arith.addf %37, %39 : vector<16x1xf32>
      %c0_39 = arith.constant 0 : index
      %c0_40 = arith.constant 0 : index
      %41 = vector.load %arg6[%c0_39, %c0_40] : memref<16x4xf32, #tpu.memory_space<vmem>>, vector<16x4xf32>
      %c0_41 = arith.constant 0 : index
      %c0_42 = arith.constant 0 : index
      %42 = vector.load %arg17[%c0_41, %c0_42] : memref<4x1xf32, #tpu.memory_space<vmem>>, vector<4x1xf32>
      %cst_43 = arith.constant dense<0.000000e+00> : vector<16x1xf32>
      %43 = tpu.matmul %41, %42, %cst_43 {dimension_numbers = #tpu.dot_dimension_numbers<[1], [0], [0], [1], [0, 0, 1, 1], [], []>} : vector<16x4xf32>, vector<4x1xf32>, vector<16x1xf32> -> vector<16x1xf32>
      %44 = arith.addf %40, %43 : vector<16x1xf32>
      %c0_44 = arith.constant 0 : index
      %c0_45 = arith.constant 0 : index
      %45 = vector.load %arg7[%c0_44, %c0_45] : memref<16x4xf32, #tpu.memory_space<vmem>>, vector<16x4xf32>
      %c0_46 = arith.constant 0 : index
      %c0_47 = arith.constant 0 : index
      %46 = vector.load %arg18[%c0_46, %c0_47] : memref<4x1xf32, #tpu.memory_space<vmem>>, vector<4x1xf32>
      %cst_48 = arith.constant dense<0.000000e+00> : vector<16x1xf32>
      %47 = tpu.matmul %45, %46, %cst_48 {dimension_numbers = #tpu.dot_dimension_numbers<[1], [0], [0], [1], [0, 0, 1, 1], [], []>} : vector<16x4xf32>, vector<4x1xf32>, vector<16x1xf32> -> vector<16x1xf32>
      %48 = arith.addf %44, %47 : vector<16x1xf32>
      %c0_49 = arith.constant 0 : index
      %c0_50 = arith.constant 0 : index
      %49 = vector.load %arg8[%c0_49, %c0_50] : memref<16x1xf32, #tpu.memory_space<vmem>>, vector<16x1xf32>
      %50 = arith.addf %48, %49 : vector<16x1xf32>
      %cst_51 = arith.constant 0.000000e+00 : f32
      %51 = vector.broadcast %cst_51 : f32 to vector<16x1xf32>
      %52 = arith.maximumf %50, %51 : vector<16x1xf32>
      %c0_52 = arith.constant 0 : index
      %c0_53 = arith.constant 0 : index
      %53 = vector.load %arg9[%c0_52, %c0_53] : memref<4x16xf32, #tpu.memory_space<vmem>>, vector<4x16xf32>
      %cst_54 = arith.constant dense<0.000000e+00> : vector<4x1xf32>
      %54 = tpu.matmul %53, %52, %cst_54 {dimension_numbers = #tpu.dot_dimension_numbers<[1], [0], [0], [1], [0, 0, 1, 1], [], []>} : vector<4x16xf32>, vector<16x1xf32>, vector<4x1xf32> -> vector<4x1xf32>
      %c0_55 = arith.constant 0 : index
      %c0_56 = arith.constant 0 : index
      %55 = vector.load %arg11[%c0_55, %c0_56] : memref<4x1xf32, #tpu.memory_space<vmem>>, vector<4x1xf32>
      %56 = arith.addf %54, %55 : vector<4x1xf32>
      %57 = arith.negf %56 : vector<4x1xf32>
      %58 = math.exp %57 : vector<4x1xf32>
      %cst_57 = arith.constant 1.000000e+00 : f32
      %59 = vector.broadcast %cst_57 : f32 to vector<4x1xf32>
      %60 = arith.addf %59, %58 : vector<4x1xf32>
      %61 = arith.divf %59, %60 : vector<4x1xf32>
      %c0_58 = arith.constant 0 : index
      %c0_59 = arith.constant 0 : index
      %62 = vector.load %arg10[%c0_58, %c0_59] : memref<4x16xf32, #tpu.memory_space<vmem>>, vector<4x16xf32>
      %cst_60 = arith.constant dense<0.000000e+00> : vector<4x1xf32>
      %63 = tpu.matmul %62, %52, %cst_60 {dimension_numbers = #tpu.dot_dimension_numbers<[1], [0], [0], [1], [0, 0, 1, 1], [], []>} : vector<4x16xf32>, vector<16x1xf32>, vector<4x1xf32> -> vector<4x1xf32>
      %c0_61 = arith.constant 0 : index
      %c0_62 = arith.constant 0 : index
      %64 = vector.load %arg12[%c0_61, %c0_62] : memref<4x1xf32, #tpu.memory_space<vmem>>, vector<4x1xf32>
      %65 = arith.addf %63, %64 : vector<4x1xf32>
      %66 = arith.negf %65 : vector<4x1xf32>
      %67 = math.exp %66 : vector<4x1xf32>
      %cst_63 = arith.constant 1.000000e+00 : f32
      %68 = vector.broadcast %cst_63 : f32 to vector<4x1xf32>
      %69 = arith.addf %68, %67 : vector<4x1xf32>
      %70 = arith.divf %68, %69 : vector<4x1xf32>
      %c0_64 = arith.constant 0 : index
      %c0_65 = arith.constant 0 : index
      %c0_66 = arith.constant 0 : index
      %71 = vector.load %arg13[%c0_64, %c0_65, %c0_66] : memref<1x4x1xf32, #tpu.memory_space<vmem>>, vector<1x4x1xf32>
      %72 = vector.shape_cast %71 : vector<1x4x1xf32> to vector<4x1xf32>
      %73 = vector.shape_cast %61 : vector<4x1xf32> to vector<1x4x1xf32>
      tpu.vector_store %arg13[%c0_64, %c0_65, %c0_66], %73 {strides = array<i32>} : memref<1x4x1xf32, #tpu.memory_space<vmem>>, vector<1x4x1xf32>,
      %c0_67 = arith.constant 0 : index
      %c0_68 = arith.constant 0 : index
      %c0_69 = arith.constant 0 : index
      %74 = vector.load %arg14[%c0_67, %c0_68, %c0_69] : memref<1x4x1xf32, #tpu.memory_space<vmem>>, vector<1x4x1xf32>
      %75 = vector.shape_cast %74 : vector<1x4x1xf32> to vector<4x1xf32>
      %76 = vector.shape_cast %70 : vector<4x1xf32> to vector<1x4x1xf32>
      tpu.vector_store %arg14[%c0_67, %c0_68, %c0_69], %76 {strides = array<i32>} : memref<1x4x1xf32, #tpu.memory_space<vmem>>, vector<1x4x1xf32>,
    } else {
    }
    return
  }
  func.func @transform_0(%arg0: i32, %arg1: i32) -> (i32, i32, i32) {
    %c0_i32 = arith.constant 0 : i32
    %c0_i32_0 = arith.constant 0 : i32
    return %arg0, %c0_i32, %arg1 : i32, i32, i32
  }
  func.func @transform_1(%arg0: i32, %arg1: i32) -> (i32, i32, i32) {
    %c0_i32 = arith.constant 0 : i32
    %c0_i32_0 = arith.constant 0 : i32
    return %arg0, %c0_i32, %arg1 : i32, i32, i32
  }
  func.func @transform_2(%arg0: i32, %arg1: i32) -> (i32, i32) {
    %c0_i32 = arith.constant 0 : i32
    %c0_i32_0 = arith.constant 0 : i32
    %c0_i32_1 = arith.constant 0 : i32
    return %c0_i32, %c0_i32_0 : i32, i32
  }
  func.func @transform_3(%arg0: i32, %arg1: i32) -> (i32, i32) {
    %c0_i32 = arith.constant 0 : i32
    %c0_i32_0 = arith.constant 0 : i32
    %c0_i32_1 = arith.constant 0 : i32
    return %c0_i32, %c0_i32_0 : i32, i32
  }
  func.func @transform_4(%arg0: i32, %arg1: i32) -> (i32, i32) {
    %c0_i32 = arith.constant 0 : i32
    %c0_i32_0 = arith.constant 0 : i32
    %c0_i32_1 = arith.constant 0 : i32
    return %c0_i32, %c0_i32_0 : i32, i32
  }
  func.func @transform_5(%arg0: i32, %arg1: i32) -> (i32, i32) {
    %c0_i32 = arith.constant 0 : i32
    %c0_i32_0 = arith.constant 0 : i32
    %c0_i32_1 = arith.constant 0 : i32
    return %c0_i32, %c0_i32_0 : i32, i32
  }
  func.func @transform_6(%arg0: i32, %arg1: i32) -> (i32, i32) {
    %c0_i32 = arith.constant 0 : i32
    %c0_i32_0 = arith.constant 0 : i32
    %c0_i32_1 = arith.constant 0 : i32
    return %c0_i32, %c0_i32_0 : i32, i32
  }
  func.func @transform_7(%arg0: i32, %arg1: i32) -> (i32, i32) {
    %c0_i32 = arith.constant 0 : i32
    %c0_i32_0 = arith.constant 0 : i32
    %c0_i32_1 = arith.constant 0 : i32
    return %c0_i32, %c0_i32_0 : i32, i32
  }
  func.func @transform_8(%arg0: i32, %arg1: i32) -> (i32, i32) {
    %c0_i32 = arith.constant 0 : i32
    %c0_i32_0 = arith.constant 0 : i32
    %c0_i32_1 = arith.constant 0 : i32
    return %c0_i32, %c0_i32_0 : i32, i32
  }
  func.func @transform_9(%arg0: i32, %arg1: i32) -> (i32, i32) {
    %c0_i32 = arith.constant 0 : i32
    %c0_i32_0 = arith.constant 0 : i32
    %c0_i32_1 = arith.constant 0 : i32
    return %c0_i32, %c0_i32_0 : i32, i32
  }
  func.func @transform_10(%arg0: i32, %arg1: i32) -> (i32, i32) {
    %c0_i32 = arith.constant 0 : i32
    %c0_i32_0 = arith.constant 0 : i32
    %c0_i32_1 = arith.constant 0 : i32
    return %c0_i32, %c0_i32_0 : i32, i32
  }
  func.func @transform_11(%arg0: i32, %arg1: i32) -> (i32, i32, i32) {
    %c0_i32 = arith.constant 0 : i32
    %c0_i32_0 = arith.constant 0 : i32
    %c0_i32_1 = arith.constant 0 : i32
    return %arg0, %c0_i32, %c0_i32_0 : i32, i32, i32
  }
  func.func @transform_12(%arg0: i32, %arg1: i32) -> (i32, i32, i32) {
    %c0_i32 = arith.constant 0 : i32
    %c0_i32_0 = arith.constant 0 : i32
    %c0_i32_1 = arith.constant 0 : i32
    return %arg0, %c0_i32, %c0_i32_0 : i32, i32, i32
  }
}

module attributes {stable_mosaic.version = 11 : i64} {
  func.func @_spatial_rectify_kernel(%arg0: i32, %arg1: i32, %arg2: memref<1x4x256xf32, #tpu.memory_space<vmem>>, %arg3: memref<1x4x256xf32, #tpu.memory_space<vmem>>, %arg4: memref<1x4x1xf32, #tpu.memory_space<vmem>>, %arg5: memref<1x4x1xf32, #tpu.memory_space<vmem>>, %arg6: memref<4x4xf32, #tpu.memory_space<vmem>>, %arg7: memref<4x4xf32, #tpu.memory_space<vmem>>, %arg8: memref<4x1xf32, #tpu.memory_space<vmem>>, %arg9: memref<1x4xf32, #tpu.memory_space<vmem>>, %arg10: memref<1x4xf32, #tpu.memory_space<vmem>>, %arg11: memref<1x1xf32, #tpu.memory_space<vmem>>, %arg12: memref<1x1xf32, #tpu.memory_space<vmem>>, %arg13: memref<1x4x256xf32, #tpu.memory_space<vmem>>, %arg14: memref<1x4x256xf32, #tpu.memory_space<vmem>>) attributes {dimension_semantics = [#tpu.dimension_semantics<parallel>, #tpu.dimension_semantics<parallel>], iteration_bounds = array<i64: 2, 1>, scalar_prefetch = 0 : i64, scratch_operands = 0 : i64, tpu.core_type = #tpu.core_type<tc>, window_params = [{transform_indices = @transform_0, window_bounds = array<i64: 1, 4, 256>}, {transform_indices = @transform_1, window_bounds = array<i64: 1, 4, 256>}, {transform_indices = @transform_2, window_bounds = array<i64: 1, 4, 1>}, {transform_indices = @transform_3, window_bounds = array<i64: 1, 4, 1>}, {pipeline_mode = #tpu.pipeline_mode<synchronous>, transform_indices = @transform_4, window_bounds = array<i64: 4, 4>}, {pipeline_mode = #tpu.pipeline_mode<synchronous>, transform_indices = @transform_5, window_bounds = array<i64: 4, 4>}, {pipeline_mode = #tpu.pipeline_mode<synchronous>, transform_indices = @transform_6, window_bounds = array<i64: 4, 1>}, {pipeline_mode = #tpu.pipeline_mode<synchronous>, transform_indices = @transform_7, window_bounds = array<i64: 1, 4>}, {pipeline_mode = #tpu.pipeline_mode<synchronous>, transform_indices = @transform_8, window_bounds = array<i64: 1, 4>}, {pipeline_mode = #tpu.pipeline_mode<synchronous>, transform_indices = @transform_9, window_bounds = array<i64: 1, 1>}, {pipeline_mode = #tpu.pipeline_mode<synchronous>, transform_indices = @transform_10, window_bounds = array<i64: 1, 1>}, {transform_indices = @transform_11, window_bounds = array<i64: 1, 4, 256>}, {transform_indices = @transform_12, window_bounds = array<i64: 1, 4, 256>}]} {
    %c0 = arith.constant 0 : index
    %c0_0 = arith.constant 0 : index
    %c0_1 = arith.constant 0 : index
    %0 = vector.load %arg2[%c0, %c0_0, %c0_1] : memref<1x4x256xf32, #tpu.memory_space<vmem>>, vector<1x4x256xf32>
    %1 = vector.shape_cast %0 : vector<1x4x256xf32> to vector<4x256xf32>
    %c0_2 = arith.constant 0 : index
    %c0_3 = arith.constant 0 : index
    %c0_4 = arith.constant 0 : index
    %2 = vector.load %arg3[%c0_2, %c0_3, %c0_4] : memref<1x4x256xf32, #tpu.memory_space<vmem>>, vector<1x4x256xf32>
    %3 = vector.shape_cast %2 : vector<1x4x256xf32> to vector<4x256xf32>
    %c0_5 = arith.constant 0 : index
    %c0_6 = arith.constant 0 : index
    %4 = vector.load %arg6[%c0_5, %c0_6] : memref<4x4xf32, #tpu.memory_space<vmem>>, vector<4x4xf32>
    %cst = arith.constant dense<0.000000e+00> : vector<4x256xf32>
    %5 = tpu.matmul %4, %1, %cst {dimension_numbers = #tpu.dot_dimension_numbers<[1], [0], [0], [1], [0, 0, 1, 1], [], []>} : vector<4x4xf32>, vector<4x256xf32>, vector<4x256xf32> -> vector<4x256xf32>
    %c0_7 = arith.constant 0 : index
    %c0_8 = arith.constant 0 : index
    %6 = vector.load %arg7[%c0_7, %c0_8] : memref<4x4xf32, #tpu.memory_space<vmem>>, vector<4x4xf32>
    %cst_9 = arith.constant dense<0.000000e+00> : vector<4x256xf32>
    %7 = tpu.matmul %6, %3, %cst_9 {dimension_numbers = #tpu.dot_dimension_numbers<[1], [0], [0], [1], [0, 0, 1, 1], [], []>} : vector<4x4xf32>, vector<4x256xf32>, vector<4x256xf32> -> vector<4x256xf32>
    %8 = arith.addf %5, %7 : vector<4x256xf32>
    %c0_10 = arith.constant 0 : index
    %c0_11 = arith.constant 0 : index
    %9 = vector.load %arg8[%c0_10, %c0_11] : memref<4x1xf32, #tpu.memory_space<vmem>>, vector<4x1xf32>
    %10 = vector.broadcast %9 : vector<4x1xf32> to vector<4x256xf32>
    %11 = arith.addf %8, %10 : vector<4x256xf32>
    %cst_12 = arith.constant 0.000000e+00 : f32
    %12 = vector.broadcast %cst_12 : f32 to vector<4x256xf32>
    %13 = arith.maximumf %11, %12 : vector<4x256xf32>
    %c0_13 = arith.constant 0 : index
    %c0_14 = arith.constant 0 : index
    %14 = vector.load %arg9[%c0_13, %c0_14] : memref<1x4xf32, #tpu.memory_space<vmem>>, vector<1x4xf32>
    %cst_15 = arith.constant dense<0.000000e+00> : vector<1x256xf32>
    %15 = tpu.matmul %14, %13, %cst_15 {dimension_numbers = #tpu.dot_dimension_numbers<[1], [0], [0], [1], [0, 0, 1, 1], [], []>} : vector<1x4xf32>, vector<4x256xf32>, vector<1x256xf32> -> vector<1x256xf32>
    %c0_16 = arith.constant 0 : index
    %c0_17 = arith.constant 0 : index
    %16 = vector.load %arg11[%c0_16, %c0_17] : memref<1x1xf32, #tpu.memory_space<vmem>>, vector<1x1xf32>
    %17 = vector.broadcast %16 : vector<1x1xf32> to vector<1x256xf32>
    %18 = arith.addf %15, %17 : vector<1x256xf32>
    %19 = arith.negf %18 : vector<1x256xf32>
    %20 = math.exp %19 : vector<1x256xf32>
    %cst_18 = arith.constant 1.000000e+00 : f32
    %21 = vector.broadcast %cst_18 : f32 to vector<1x256xf32>
    %22 = arith.addf %21, %20 : vector<1x256xf32>
    %23 = arith.divf %21, %22 : vector<1x256xf32>
    %c0_19 = arith.constant 0 : index
    %c0_20 = arith.constant 0 : index
    %24 = vector.load %arg10[%c0_19, %c0_20] : memref<1x4xf32, #tpu.memory_space<vmem>>, vector<1x4xf32>
    %cst_21 = arith.constant dense<0.000000e+00> : vector<1x256xf32>
    %25 = tpu.matmul %24, %13, %cst_21 {dimension_numbers = #tpu.dot_dimension_numbers<[1], [0], [0], [1], [0, 0, 1, 1], [], []>} : vector<1x4xf32>, vector<4x256xf32>, vector<1x256xf32> -> vector<1x256xf32>
    %c0_22 = arith.constant 0 : index
    %c0_23 = arith.constant 0 : index
    %26 = vector.load %arg12[%c0_22, %c0_23] : memref<1x1xf32, #tpu.memory_space<vmem>>, vector<1x1xf32>
    %27 = vector.broadcast %26 : vector<1x1xf32> to vector<1x256xf32>
    %28 = arith.addf %25, %27 : vector<1x256xf32>
    %29 = arith.negf %28 : vector<1x256xf32>
    %30 = math.exp %29 : vector<1x256xf32>
    %cst_24 = arith.constant 1.000000e+00 : f32
    %31 = vector.broadcast %cst_24 : f32 to vector<1x256xf32>
    %32 = arith.addf %31, %30 : vector<1x256xf32>
    %33 = arith.divf %31, %32 : vector<1x256xf32>
    %c0_25 = arith.constant 0 : index
    %c0_26 = arith.constant 0 : index
    %c0_27 = arith.constant 0 : index
    %34 = vector.load %arg4[%c0_25, %c0_26, %c0_27] : memref<1x4x1xf32, #tpu.memory_space<vmem>>, vector<1x4x1xf32>
    %35 = vector.shape_cast %34 : vector<1x4x1xf32> to vector<4x1xf32>
    %c0_28 = arith.constant 0 : index
    %c0_29 = arith.constant 0 : index
    %c0_30 = arith.constant 0 : index
    %36 = vector.load %arg5[%c0_28, %c0_29, %c0_30] : memref<1x4x1xf32, #tpu.memory_space<vmem>>, vector<1x4x1xf32>
    %37 = vector.shape_cast %36 : vector<1x4x1xf32> to vector<4x1xf32>
    %38 = vector.broadcast %37 : vector<4x1xf32> to vector<4x256xf32>
    %39 = arith.mulf %38, %3 : vector<4x256xf32>
    %cst_31 = arith.constant 5.000000e-01 : f32
    %40 = vector.broadcast %cst_31 : f32 to vector<4x256xf32>
    %41 = arith.mulf %40, %39 : vector<4x256xf32>
    %42 = arith.addf %1, %41 : vector<4x256xf32>
    %43 = vector.broadcast %33 : vector<1x256xf32> to vector<4x256xf32>
    %44 = arith.mulf %43, %3 : vector<4x256xf32>
    %cst_32 = arith.constant 5.000000e-01 : f32
    %45 = vector.broadcast %cst_32 : f32 to vector<4x256xf32>
    %46 = arith.mulf %45, %44 : vector<4x256xf32>
    %47 = arith.addf %42, %46 : vector<4x256xf32>
    %48 = vector.broadcast %35 : vector<4x1xf32> to vector<4x256xf32>
    %49 = arith.mulf %48, %1 : vector<4x256xf32>
    %cst_33 = arith.constant 5.000000e-01 : f32
    %50 = vector.broadcast %cst_33 : f32 to vector<4x256xf32>
    %51 = arith.mulf %50, %49 : vector<4x256xf32>
    %52 = arith.addf %3, %51 : vector<4x256xf32>
    %53 = vector.broadcast %23 : vector<1x256xf32> to vector<4x256xf32>
    %54 = arith.mulf %53, %1 : vector<4x256xf32>
    %cst_34 = arith.constant 5.000000e-01 : f32
    %55 = vector.broadcast %cst_34 : f32 to vector<4x256xf32>
    %56 = arith.mulf %55, %54 : vector<4x256xf32>
    %57 = arith.addf %52, %56 : vector<4x256xf32>
    %c0_35 = arith.constant 0 : index
    %c0_36 = arith.constant 0 : index
    %c0_37 = arith.constant 0 : index
    %58 = vector.load %arg13[%c0_35, %c0_36, %c0_37] : memref<1x4x256xf32, #tpu.memory_space<vmem>>, vector<1x4x256xf32>
    %59 = vector.shape_cast %58 : vector<1x4x256xf32> to vector<4x256xf32>
    %60 = vector.shape_cast %47 : vector<4x256xf32> to vector<1x4x256xf32>
    tpu.vector_store %arg13[%c0_35, %c0_36, %c0_37], %60 {strides = array<i32>} : memref<1x4x256xf32, #tpu.memory_space<vmem>>, vector<1x4x256xf32>,
    %c0_38 = arith.constant 0 : index
    %c0_39 = arith.constant 0 : index
    %c0_40 = arith.constant 0 : index
    %61 = vector.load %arg14[%c0_38, %c0_39, %c0_40] : memref<1x4x256xf32, #tpu.memory_space<vmem>>, vector<1x4x256xf32>
    %62 = vector.shape_cast %61 : vector<1x4x256xf32> to vector<4x256xf32>
    %63 = vector.shape_cast %57 : vector<4x256xf32> to vector<1x4x256xf32>
    tpu.vector_store %arg14[%c0_38, %c0_39, %c0_40], %63 {strides = array<i32>} : memref<1x4x256xf32, #tpu.memory_space<vmem>>, vector<1x4x256xf32>,
    return
  }
  func.func @transform_0(%arg0: i32, %arg1: i32) -> (i32, i32, i32) {
    %c0_i32 = arith.constant 0 : i32
    %c0_i32_0 = arith.constant 0 : i32
    return %arg0, %c0_i32, %arg1 : i32, i32, i32
  }
  func.func @transform_1(%arg0: i32, %arg1: i32) -> (i32, i32, i32) {
    %c0_i32 = arith.constant 0 : i32
    %c0_i32_0 = arith.constant 0 : i32
    return %arg0, %c0_i32, %arg1 : i32, i32, i32
  }
  func.func @transform_2(%arg0: i32, %arg1: i32) -> (i32, i32, i32) {
    %c0_i32 = arith.constant 0 : i32
    %c0_i32_0 = arith.constant 0 : i32
    %c0_i32_1 = arith.constant 0 : i32
    return %arg0, %c0_i32, %c0_i32_0 : i32, i32, i32
  }
  func.func @transform_3(%arg0: i32, %arg1: i32) -> (i32, i32, i32) {
    %c0_i32 = arith.constant 0 : i32
    %c0_i32_0 = arith.constant 0 : i32
    %c0_i32_1 = arith.constant 0 : i32
    return %arg0, %c0_i32, %c0_i32_0 : i32, i32, i32
  }
  func.func @transform_4(%arg0: i32, %arg1: i32) -> (i32, i32) {
    %c0_i32 = arith.constant 0 : i32
    %c0_i32_0 = arith.constant 0 : i32
    %c0_i32_1 = arith.constant 0 : i32
    return %c0_i32, %c0_i32_0 : i32, i32
  }
  func.func @transform_5(%arg0: i32, %arg1: i32) -> (i32, i32) {
    %c0_i32 = arith.constant 0 : i32
    %c0_i32_0 = arith.constant 0 : i32
    %c0_i32_1 = arith.constant 0 : i32
    return %c0_i32, %c0_i32_0 : i32, i32
  }
  func.func @transform_6(%arg0: i32, %arg1: i32) -> (i32, i32) {
    %c0_i32 = arith.constant 0 : i32
    %c0_i32_0 = arith.constant 0 : i32
    %c0_i32_1 = arith.constant 0 : i32
    return %c0_i32, %c0_i32_0 : i32, i32
  }
  func.func @transform_7(%arg0: i32, %arg1: i32) -> (i32, i32) {
    %c0_i32 = arith.constant 0 : i32
    %c0_i32_0 = arith.constant 0 : i32
    %c0_i32_1 = arith.constant 0 : i32
    return %c0_i32, %c0_i32_0 : i32, i32
  }
  func.func @transform_8(%arg0: i32, %arg1: i32) -> (i32, i32) {
    %c0_i32 = arith.constant 0 : i32
    %c0_i32_0 = arith.constant 0 : i32
    %c0_i32_1 = arith.constant 0 : i32
    return %c0_i32, %c0_i32_0 : i32, i32
  }
  func.func @transform_9(%arg0: i32, %arg1: i32) -> (i32, i32) {
    %c0_i32 = arith.constant 0 : i32
    %c0_i32_0 = arith.constant 0 : i32
    %c0_i32_1 = arith.constant 0 : i32
    return %c0_i32, %c0_i32_0 : i32, i32
  }
  func.func @transform_10(%arg0: i32, %arg1: i32) -> (i32, i32) {
    %c0_i32 = arith.constant 0 : i32
    %c0_i32_0 = arith.constant 0 : i32
    %c0_i32_1 = arith.constant 0 : i32
    return %c0_i32, %c0_i32_0 : i32, i32
  }
  func.func @transform_11(%arg0: i32, %arg1: i32) -> (i32, i32, i32) {
    %c0_i32 = arith.constant 0 : i32
    %c0_i32_0 = arith.constant 0 : i32
    return %arg0, %c0_i32, %arg1 : i32, i32, i32
  }
  func.func @transform_12(%arg0: i32, %arg1: i32) -> (i32, i32, i32) {
    %c0_i32 = arith.constant 0 : i32
    %c0_i32_0 = arith.constant 0 : i32
    return %arg0, %c0_i32, %arg1 : i32, i32, i32
  }
}

</mosaic_0001>

<bundles_post_ra>
// kernel: feature_rectify.3
= control target key start
LH: loop header
LB: loop body
LE: loop exit
PB: predicated region body
PF: predicated region fallthrough
CT: control target
= control target key end

     0   :  { %s1291_s25 = smov 0   ;;  %s1293_s26 = smov 0   ;;  %s1433_s0 = inlined_call_operand.vmem [shape: f32[2,4,256], index: 0, kind: input, shape index: {}]   ;;  %s1434_s1 = inlined_call_operand.vmem [shape: f32[2,4,256], index: 1, kind: input, shape index: {}]   ;;  %s1435_s2 = inlined_call_operand.vmem [shape: f32[2,4,1], index: 2, kind: input, shape index: {}]   ;;  %s1436_s3 = inlined_call_operand.vmem [shape: f32[2,4,1], index: 3, kind: input, shape index: {}]   ;;  %s1437_s4 = inlined_call_operand.vmem [shape: f32[4,4], index: 4, kind: input, shape index: {}]   ;;  %s1438_s5 = inlined_call_operand.vmem [shape: f32[4,4], index: 5, kind: input, shape index: {}]   ;;  %s1439_s6 = inlined_call_operand.vmem [shape: f32[4,1], index: 6, kind: input, shape index: {}]   ;;  %s1440_s7 = inlined_call_operand.vmem [shape: f32[1,4], index: 7, kind: input, shape index: {}]   ;;  %s1441_s8 = inlined_call_operand.vmem [shape: f32[1,4], index: 8, kind: input, shape index: {}]   ;;  %s1442_s9 = inlined_call_operand.<no memory space> [shape: f32[1,1], index: 9, kind: input, shape index: {}]   ;;  %s1443_s11 = inlined_call_operand.vmem [shape: f32[2,4,256], index: 11, kind: output, shape index: {0}]   ;;  %s1444_s12 = inlined_call_operand.vmem [shape: f32[2,4,256], index: 12, kind: output, shape index: {1}]   ;;  %s1445_s10 = inlined_call_operand.<no memory space> [shape: f32[1,1], index: 10, kind: input, shape index: {}]  }
   0x1   :  { %v18_v0 = vstv %s1442_s9  ;;  %v20_v1 = vstv %s1445_s10  ;;  %s1295_s27 = smov 0  }
   0x2   :  { %19 = vst [vmem:[#allocation2] sm:$0x1] %v18_v0 }
   0x3   :  { %21 = vst [vmem:[#allocation3] sm:$0x1] %v20_v1 }
   0x4 LB: > { %s39_s9 = sadd.s32 1, %s1213_s26  ;;  %p1114_p0 = scmp.ge.s32.totalorder %s1217_s27, 1  ;;  %s1217_s27 = sphi %s1295_s27, %s27_s27   ;;  %s1213_s26 = sphi %s1293_s26, %s1451_s26   ;;  %s1209_s25 = sphi %s1291_s25, %s1450_s25  }
   0x5   : > { %p41_p1 = scmp.ge.s32.totalorder %s39_s9, 2  ;;  %p427_p2 = scmp.lt.s32.totalorder %s1217_s27, 3 }
   0x7   : > { %s1453_s9 = smov (%p41_p1, %s39_s9), 0  ;;  %p428_p3 = pnand %p1114_p0, %p427_p2 }
   0x8   : > { %p504_p4 = scmp.lt.s32.totalorder (!%p428_p3), %s1209_s25, 1 }
   0x9   : > { %431 = sbr.rel (%p428_p3) target bundleno = 351 (0x15f), region = 64 }
   0xe   : > { %v1219_v2 = vmov 0   ;;  %v659_v3 = vld [vmem:[%s1439_s6] sm:$0xf]  ;;  %s1455_s25 = smov (!%p504_p4, %s1209_s25), 1  ;;  %v670_v5 = vld [vmem:[#allocation2] sm:$0x1] }
   0xf   : > { %1176 = vset.pattern.permute.xlu0 %v1219_v2  ;;  %1177 = vset.pattern.permute.xlu1 %v1219_v2  ;;  %s1315_s29 = sshll.u32 %s1455_s25, 3  ;;  %vm563_vm0 = vcmask 1043456   ;;  %v554_v7 = vld [vmem:[%s1438_s5] sm:$0xf]  ;;  %vm559_vm1 = vcmask 31744   ;;  %s1119_s22 = sshll.u32 %s1455_s25, 2 }
  0x10   : > { %662 = vperm.xlu0 %1176, %v659_v3   ;;  %1178 = vset.pattern.permute.xlu2 %v1219_v2  ;;  %s521_s14 = scalar_lea.vmem %s1434_s1, %s1315_s29  ;;  %s511_s17 = scalar_lea.vmem %s1433_s0, %s1315_s29  ;;  %v553_v10 = vld [vmem:[%s1437_s4] sm:$0xf]  ;;  %v765_v13 = vld [vmem:[#allocation3] sm:$0x1] }
  0x11   : > { %v1321_v4 = vld [vmem:[%s521_s14] sm:$0xff]  ;;  %s526_s10 = scalar_lea.vmem %s1435_s2, %s1119_s22  ;;  %768 = vperm.xlu1 %1177, %v765_v13   ;;  %s530_s13 = scalar_lea.vmem %s1436_s3, %s1119_s22 }
  0x12   : > { %556 = vst [vmem:[#allocation1] ss:$2 sm:$0xff] %v1321_v4  ;;  %v1328_v6 = vld [vmem:[%s511_s17] sm:$0xff]  ;;  %s549_s19 = scalar_lea.vmem %s1444_s12, %s1315_s29  ;;  %s539_s22 = scalar_lea.vmem %s1443_s11, %s1315_s29 }
  0x13   : > { %v853_v14 = vld [vmem:[%s526_s10] sm:$0xf] }
  0x14   : > { %894 = vperm.xlu2 %1178, %v853_v14   ;;  %v854_v15 = vld [vmem:[%s530_s13] sm:$0xf] }
  0x15   : > { %v669_v27 = vld [vmem:[%s1440_s7] sm:$0x1] }
  0x16   : > { %v764_v28 = vld [vmem:[%s1441_s8] sm:$0x1] }
  0x18   : > { %673 = vperm.xlu0 %1176, %v670_v5  }
  0x19   : > { %v557_v8 = vld.sshfl [vmem:[#allocation1] sm:$0xff pattern:$0x75316420]  ;;  %v558_v9 = vld.sshfl [vmem:[#allocation1 + $0x8] sm:$0xff pattern:$0x75316420]  ;;  %857 = vperm.xlu1 %1177, %v854_v15  }
  0x1a   : > { %609 = vst [vmem:[#allocation1] ss:$2 sm:$0xff] %v1328_v6  ;;  %1125 = vmatpush.msk.msra.mxu0 %vm563_vm0, %v557_v8  ;;  %1127 = vmatpush.msk.msra.mxu1 %vm563_vm0, %v558_v9 }
  0x1b   : > { %1126 = vmatmul.msk.f32.vlgmr.msra.gmra.mxu0 %vm559_vm1, %v554_v7  ;;  %1128 = vmatmul.msk.f32.vlgmr.msra.gmra.mxu1 %vm559_vm1, %v554_v7 }
  0x21   : > { %v610_v11 = vld.sshfl [vmem:[#allocation1] sm:$0xff pattern:$0x75316420]  ;;  %v611_v12 = vld.sshfl [vmem:[#allocation1 + $0x8] sm:$0xff pattern:$0x75316420] }
  0x22   : > { %1129 = vmatpush.msk.msra.mxu2 %vm563_vm0, %v610_v11  ;;  %1131 = vmatpush.msk.msra.mxu3 %vm563_vm0, %v611_v12  ;;  %860 = vst [vmem:[#allocation1] ss:$2 sm:$0xff] %v1321_v4 }
  0x23   : > { %1130 = vmatmul.msk.f32.vlgmr.msra.gmra.mxu2 %vm559_vm1, %v553_v10  ;;  %1132 = vmatmul.msk.f32.vlgmr.msra.gmra.mxu3 %vm559_vm1, %v553_v10 }
  0x29   : > { %v1367_v29 = vld.sshfl [vmem:[#allocation1] sm:$0xff pattern:$0x75316420]  ;;  %v1369_v30 = vld.sshfl [vmem:[#allocation1 + $0x8] sm:$0xff pattern:$0x75316420] }
  0x2a   : > { %877 = vst [vmem:[#allocation1] ss:$2 sm:$0xff] %v1321_v4 }
  0x31   : > { %v1372_v31 = vld.sshfl [vmem:[#allocation1] sm:$0xff pattern:$0x75316420]  ;;  %v1374_v32 = vld.sshfl [vmem:[#allocation1 + $0x8] sm:$0xff pattern:$0x75316420] }
  0x32   : > { %897 = vst [vmem:[#allocation1] ss:$2 sm:$0xff] %v1328_v6 }
  0x39   : > { %v898_v34 = vld.sshfl [vmem:[#allocation1] sm:$0xff pattern:$0x75316420]  ;;  %v899_v35 = vld.sshfl [vmem:[#allocation1 + $0x8] sm:$0xff pattern:$0x75316420] }
  0x3a   : > { %914 = vst [vmem:[#allocation1] ss:$2 sm:$0xff] %v1328_v6 }
  0x6e   : > { %v895_v54 = vpop.permute.xlu2 %894 }
  0x6f   : > { %v903_v56 = vmul.f32 %v899_v35, %v895_v54  ;;  %v902_v60 = vmul.f32 %v898_v34, %v895_v54  ;;  %v915_v35 = vld.sshfl [vmem:[#allocation1] sm:$0xff pattern:$0x75316420] }
  0x71   : > { %v905_v61 = vmul.f32 0.5, %v903_v56  ;;  %v904_v5 = vmul.f32 0.5, %v902_v60 }
  0x73   : > { %v908_v7 = vrot.slane %v905_v61, 4 }
  0x82   : > { %v663_v22 = vpop.permute.xlu0 %662 }
  0x83   : > { %v769_v43 = vpop.permute.xlu1 %768 }
  0x84   : > { %v771_v44 = vperm.slane %v769_v43, 0 }
  0x8a   : > { %v674_v33 = vpop.permute.xlu0 %673 }
  0x8b   : > { %v676_v36 = vperm.slane %v674_v33, 0  ;;  %v858_v11 = vpop.permute.xlu1 %857 }
  0x98   : > { %v585_v16 = vpop.f32.mrf.mxu0  ;;  %v605_v17 = vpop.f32.mrf.mxu1 }
  0xa6   : > { %v636_v18 = vpop.f32.mrf.mxu2  ;;  %v656_v19 = vpop.f32.mrf.mxu3 }
  0xa7   : > { %v637_v20 = vadd.f32 %v636_v18, %v585_v16  ;;  %v657_v21 = vadd.f32 %v656_v19, %v605_v17  ;;  %v866_v18 = vmul.f32 %v1369_v30, %v858_v11  ;;  %v909_v19 = vsel %vm563_vm0, %v904_v5, %v908_v7 }
  0xa9   : > { %v665_v23 = vadd.f32 %v663_v22, %v637_v20  ;;  %v666_v24 = vadd.f32 %v663_v22, %v657_v21 }
  0xab   : > { %v667_v25 = vmax.f32 %v665_v23, 0.0  ;;  %v668_v26 = vmax.f32 %v666_v24, 0.0 }
  0xad   : > { %1133 = vmatpush.msk.msrb.mxu0 %vm563_vm0, %v667_v25  ;;  %1135 = vmatpush.msk.msrb.mxu1 %vm563_vm0, %v668_v26 }
  0xae   : > { %1139 = vmatpush.msk.msrb.mxu2 %vm563_vm0, %v667_v25  ;;  %1141 = vmatpush.msk.msrb.mxu3 %vm563_vm0, %v668_v26 }
  0xaf   : > { %1134 = vmatmul.msk.f32.vlgmr.msrb.gmra.mxu0 %vm559_vm1, %v669_v27  ;;  %1136 = vmatmul.msk.f32.vlgmr.msrb.gmra.mxu1 %vm559_vm1, %v669_v27 }
  0xb0   : > { %1140 = vmatmul.msk.f32.vlgmr.msrb.gmra.mxu2 %vm559_vm1, %v764_v28  ;;  %1142 = vmatmul.msk.f32.vlgmr.msrb.gmra.mxu3 %vm559_vm1, %v764_v28 }
 0x12c   : > { %v703_v37 = vpop.f32.mrf.mxu0  ;;  %v723_v38 = vpop.f32.mrf.mxu1 }
 0x12d   : > { %v704_v39 = vadd.f32 %v703_v37, %v676_v36  ;;  %v724_v40 = vadd.f32 %v723_v38, %v676_v36 }
 0x12f   : > { %v1137_v41 = vmul.f32 -1.442695, %v704_v39  ;;  %v1138_v42 = vmul.f32 -1.442695, %v724_v40 }
 0x130   : > { %v916_v39 = vld.sshfl [vmem:[#allocation1 + $0x8] sm:$0xff pattern:$0x75316420] }
 0x131   : > { %1179 = vpow2.f32 %v1137_v41 }
 0x132   : > { %1181 = vpow2.f32 %v1138_v42 }
 0x133   : > { %v792_v45 = vpop.f32.mrf.mxu2  ;;  %v812_v46 = vpop.f32.mrf.mxu3 }
 0x134   : > { %v793_v47 = vadd.f32 %v792_v45, %v771_v44  ;;  %v813_v48 = vadd.f32 %v812_v46, %v771_v44 }
 0x136   : > { %v1143_v49 = vmul.f32 -1.442695, %v793_v47  ;;  %v1144_v50 = vmul.f32 -1.442695, %v813_v48 }
 0x137   : > { %v1180_v51 = vpop.eup %1179 }
 0x138   : > { %v1182_v52 = vpop.eup %1181  ;;  %v732_v53 = vadd.f32 1.0, %v1180_v51  ;;  %1183 = vpow2.f32 %v1143_v49  ;;  %v865_v51 = vmul.f32 %v1367_v29, %v858_v11 }
 0x139   : > { %v733_v55 = vadd.f32 1.0, %v1182_v52  ;;  %1185 = vpow2.f32 %v1144_v50  ;;  %v868_v52 = vmul.f32 0.5, %v866_v18 }
 0x13a   : > { %1187 = vrcp.f32 %v732_v53  ;;  %v743_v8 = vand.u32 2147483647, %v732_v53  ;;  %v745_v9 = vand.u32 2147483648, %v732_v53  ;;  %vm739_vm4 = vweird.f32 %v732_v53 }
 0x13b   : > { %1189 = vrcp.f32 %v733_v55  ;;  %v758_v13 = vand.u32 2147483647, %v733_v55  ;;  %v760_v14 = vand.u32 2147483648, %v733_v55  ;;  %vm754_vm7 = vweird.f32 %v733_v55 }
 0x13c   : > { %vm1390_vm6 = vcmp.eq.f32.partialorder %v743_v8, 8.507059e+37  ;;  %v746_v25 = vor.u32 1.1754944e-38, %v745_v9  ;;  %v867_v29 = vmul.f32 0.5, %v865_v51 }
 0x13d   : > { %vm759_vm9 = vcmp.eq.f32.partialorder %v758_v13, 8.507059e+37  ;;  %v761_v26 = vor.u32 1.1754944e-38, %v760_v14 }
 0x13e   : > { %v1184_v57 = vpop.eup %1183 }
 0x13f   : > { %v1186_v58 = vpop.eup %1185  ;;  %v1378_v59 = vadd.f32 1.0, %v1184_v57 }
 0x140   : > { %v1188_v62 = vpop.eup %1187  ;;  %v1380_v63 = vadd.f32 1.0, %v1186_v58  ;;  %v911_v58 = vadd.f32 %v909_v19, %v1321_v4 }
 0x141   : > { %v1190_v0 = vpop.eup %1189  ;;  %v735_v1 = vmul.f32 %v1188_v62, %v732_v53  ;;  %1191 = vrcp.f32 %v1378_v59  ;;  %vm740_vm2 = vweird.f32 %v1188_v62  ;;  %v832_v33 = vand.u32 2147483647, %v1378_v59 }
 0x142   : > { %v750_v2 = vmul.f32 %v1190_v0, %v733_v55  ;;  %1193 = vrcp.f32 %v1380_v63  ;;  %vm755_vm3 = vweird.f32 %v1190_v0  ;;  %vm1386_vm5 = vmor %vm739_vm4, %vm740_vm2  ;;  %v834_v36 = vand.u32 2147483648, %v1378_v59 }
 0x143   : > { %v736_v3 = vsub.f32 1.0, %v735_v1  ;;  %vm756_vm8 = vmor %vm754_vm7, %vm755_vm3  ;;  %vm828_vm11 = vweird.f32 %v1378_v59  ;;  %v847_v44 = vand.u32 2147483647, %v1380_v63  ;;  %v849_v45 = vand.u32 2147483648, %v1380_v63 }
 0x144   : > { %v751_v10 = vsub.f32 1.0, %v750_v2  ;;  %v835_v50 = vor.u32 1.1754944e-38, %v834_v36  ;;  %vm843_vm14 = vweird.f32 %v1380_v63  ;;  %vm833_vm15 = vcmp.eq.f32.partialorder %v832_v33, 8.507059e+37 }
 0x145   : > { %v737_v12 = vmul.f32 %v1188_v62, %v736_v3  ;;  %vm848_vm2 = vcmp.eq.f32.partialorder %v847_v44, 8.507059e+37  ;;  %v850_v56 = vor.u32 1.1754944e-38, %v849_v45 }
 0x146   : > { %v752_v15 = vmul.f32 %v1190_v0, %v751_v10 }
 0x147   : > { %v1192_v16 = vpop.eup %1191  ;;  %v738_v17 = vadd.f32 %v1188_v62, %v737_v12 }
 0x148   : > { %v753_v22 = vadd.f32 %v1190_v0, %v752_v15  ;;  %v824_v23 = vmul.f32 %v1192_v16, %v1378_v59  ;;  %v1194_v24 = vpop.eup %1193  ;;  %vm829_vm10 = vweird.f32 %v1192_v16 }
 0x149   : > { %v742_v27 = vsel %vm1386_vm5, %v1188_v62, %v738_v17  ;;  %v839_v34 = vmul.f32 %v1194_v24, %v1380_v63  ;;  %vm844_vm12 = vweird.f32 %v1194_v24  ;;  %vm830_vm13 = vmor %vm828_vm11, %vm829_vm10 }
 0x14a   : > { %v757_v28 = vsel %vm756_vm8, %v1190_v0, %v753_v22  ;;  %v825_v30 = vsub.f32 1.0, %v824_v23  ;;  %v747_v37 = vsel %vm1390_vm6, %v746_v25, %v742_v27  ;;  %vm845_vm1 = vmor %vm843_vm14, %vm844_vm12  ;;  %v871_v0 = vrot.slane %v868_v52, 4 }
 0x14b   : > { %v762_v38 = vsel %vm759_vm9, %v761_v26, %v757_v28  ;;  %v840_v41 = vsub.f32 1.0, %v839_v34  ;;  %v912_v42 = vperm.slane %v747_v37, 0 }
 0x14c   : > { %v826_v40 = vmul.f32 %v1192_v16, %v825_v30  ;;  %v913_v43 = vperm.slane %v762_v38, 0  ;;  %v872_v7 = vsel %vm563_vm0, %v867_v29, %v871_v0 }
 0x14d   : > { %v841_v47 = vmul.f32 %v1194_v24, %v840_v41  ;;  %v919_v48 = vmul.f32 %v915_v35, %v912_v42  ;;  %v874_v11 = vadd.f32 %v872_v7, %v1328_v6 }
 0x14e   : > { %v827_v46 = vadd.f32 %v1192_v16, %v826_v40  ;;  %v920_v49 = vmul.f32 %v916_v39, %v913_v43 }
 0x14f   : > { %v842_v53 = vadd.f32 %v1194_v24, %v841_v47  ;;  %v921_v61 = vmul.f32 0.5, %v919_v48 }
 0x150   : > { %v831_v54 = vsel %vm830_vm13, %v1192_v16, %v827_v46  ;;  %v922_v55 = vmul.f32 0.5, %v920_v49 }
 0x151   : > { %v836_v57 = vsel %vm833_vm15, %v835_v50, %v831_v54  ;;  %v846_v59 = vsel %vm845_vm1, %v1194_v24, %v842_v53 }
 0x152   : > { %v875_v60 = vperm.slane %v836_v57, 0  ;;  %v925_v62 = vrot.slane %v922_v55, 4  ;;  %v851_v63 = vsel %vm848_vm2, %v850_v56, %v846_v59 }
 0x153   : > { %v876_v1 = vperm.slane %v851_v63, 0 }
 0x154   : > { %v926_v2 = vsel %vm563_vm0, %v921_v61, %v925_v62  ;;  %v882_v5 = vmul.f32 %v1372_v31, %v875_v60 }
 0x155   : > { %v928_v3 = vadd.f32 %v926_v2, %v911_v58  ;;  %v883_v4 = vmul.f32 %v1374_v32, %v876_v1 }
 0x156   : > { %v884_v9 = vmul.f32 0.5, %v882_v5 }
 0x157   : > { %930 = vst [vmem:[%s549_s19] sm:$0xff] %v928_v3  ;;  %v885_v8 = vmul.f32 0.5, %v883_v4 }
 0x159   : > { %v888_v10 = vrot.slane %v885_v8, 4 }
 0x15b   : > { %v889_v12 = vsel %vm563_vm0, %v884_v9, %v888_v10 }
 0x15c   : > { %v891_v13 = vadd.f32 %v889_v12, %v874_v11 }
 0x15e   : > { %929 = vst [vmem:[%s539_s22] sm:$0xff] %v891_v13 }
 0x15f PF: > { %s27_s27 = sadd.s32 1, %s1217_s27   ;;  %s1450_s25 = smov %s1213_s26 }
 0x160   : > { %p24_p5 = scmp.ge.s32.totalorder %s27_s27, 4   ;;  %s1451_s26 = smov %s1453_s9 }
 0x162   :  { %26 = sbr.rel (!%p24_p5) target bundleno = 4 (0x4), region = 115 }

// kernel: feature_rectify.2
= control target key start
LH: loop header
LB: loop body
LE: loop exit
PB: predicated region body
PF: predicated region fallthrough
CT: control target
= control target key end

     0   :  { %s1073_s21 = smov 0   ;;  %s1075_s22 = smov 0   ;;  %s1188_s0 = inlined_call_operand.vmem [shape: f32[2,4,256], index: 0, kind: input, shape index: {}]   ;;  %s1189_s1 = inlined_call_operand.vmem [shape: f32[2,4,256], index: 1, kind: input, shape index: {}]   ;;  %s1190_s2 = inlined_call_operand.vmem [shape: f32[16,4], index: 2, kind: input, shape index: {}]   ;;  %s1191_s3 = inlined_call_operand.vmem [shape: f32[16,4], index: 3, kind: input, shape index: {}]   ;;  %s1192_s4 = inlined_call_operand.vmem [shape: f32[16,4], index: 4, kind: input, shape index: {}]   ;;  %s1193_s5 = inlined_call_operand.vmem [shape: f32[16,4], index: 5, kind: input, shape index: {}]   ;;  %s1194_s6 = inlined_call_operand.vmem [shape: f32[16,1], index: 6, kind: input, shape index: {}]   ;;  %s1195_s7 = inlined_call_operand.vmem [shape: f32[4,16], index: 7, kind: input, shape index: {}]   ;;  %s1196_s8 = inlined_call_operand.vmem [shape: f32[4,16], index: 8, kind: input, shape index: {}]   ;;  %s1197_s9 = inlined_call_operand.vmem [shape: f32[4,1], index: 9, kind: input, shape index: {}]   ;;  %s1198_s10 = inlined_call_operand.vmem [shape: f32[4,1], index: 10, kind: input, shape index: {}]   ;;  %s1199_s11 = inlined_call_operand.vmem [shape: f32[2,4,1], index: 11, kind: output, shape index: {0}]   ;;  %s1200_s12 = inlined_call_operand.vmem [shape: f32[2,4,1], index: 12, kind: output, shape index: {1}]  }
   0x1   :  { %s1077_s23 = smov 0  }
   0x2 LB: > { %s35_s24 = sadd.s32 1, %s1000_s22  ;;  %p921_p0 = scmp.ge.s32.totalorder %s1004_s23, 1  ;;  %s1004_s23 = sphi %s1077_s23, %s23_s23   ;;  %s1000_s22 = sphi %s1075_s22, %s1202_s22   ;;  %s996_s21 = sphi %s1073_s21, %s1201_s21  }
   0x3   : > { %p37_p1 = scmp.ge.s32.totalorder %s35_s24, 2  ;;  %p401_p2 = scmp.lt.s32.totalorder %s1004_s23, 3 }
   0x5   : > { %s1204_s24 = smov (%p37_p1, %s35_s24), 0  ;;  %p402_p3 = pnand %p921_p0, %p401_p2 }
   0x6   : > { %p460_p4 = scmp.lt.s32.totalorder (!%p402_p3), %s996_s21, 1 }
   0x7   : > { %405 = sbr.rel (%p402_p3) target bundleno = 486 (0x1e6), region = 64 }
   0xc   : > { %s1206_s21 = smov (!%p460_p4, %s996_s21), 1  ;;  %vm491_vm0 = vcmask 3072   ;;  %v1006_v1 = vmov -inf   ;;  %vm505_vm1 = vcmask 1043456   ;;  %v1007_v23 = vmov 0.0   ;;  %v563_v32 = vld [vmem:[%s1191_s3] sm:$0xff] }
   0xd   : > { %s946_s25 = sshll.u32 %s1206_s21, 3  ;;  %494 = vst.msk [vmem:[#allocation4] sm:$0xf] %vm491_vm0, %v1006_v1  ;;  %vm565_vm2 = vcmask 31744   ;;  %v630_v39 = vld [vmem:[%s1192_s4] sm:$0xff]  ;;  %v564_v41 = vld [vmem:[%s1191_s3 + $0x8] sm:$0xff] }
   0xe   : > { %s467_s28 = scalar_lea.vmem %s1188_s0, %s946_s25  ;;  %s477_s13 = scalar_lea.vmem %s1189_s1, %s946_s25  ;;  %495 = vst.msk [vmem:[#allocation5] sm:$0xf] %vm491_vm0, %v1006_v1  ;;  %v667_v42 = vld [vmem:[%s1193_s5] sm:$0xff]  ;;  %v631_v43 = vld [vmem:[%s1192_s4 + $0x8] sm:$0xff]  ;;  %vm712_vm3 = vcmask 130048  }
   0xf   : > { %v496_v0 = vld [vmem:[%s467_s28] sm:$0xff]  ;;  %493 = vst.msk [vmem:[#allocation3] sm:$0xf] %vm491_vm0, %v1007_v23  ;;  %v668_v48 = vld [vmem:[%s1193_s5 + $0x8] sm:$0xff]  ;;  %s926_s14 = sshll.u32 %s1206_s21, 2 }
  0x10   : > { %500 = vst [vmem:[#allocation1] ss:$2 sm:$0xff] %v496_v0  ;;  %v497_v2 = vld [vmem:[%s477_s13] sm:$0xff]  ;;  %v562_v49 = vld [vmem:[%s1190_s2 + $0x8] sm:$0xff]  ;;  %s482_s17 = scalar_lea.vmem %s1199_s11, %s926_s14  ;;  %s486_s19 = scalar_lea.vmem %s1200_s12, %s926_s14 }
  0x11   : > { %492 = vst.msk [vmem:[#allocation2] sm:$0xf] %vm491_vm0, %v1007_v23  ;;  %v561_v47 = vld [vmem:[%s1190_s2] sm:$0xff]  ;;  %v705_v63 = vld [vmem:[%s1194_s6 + $0x8] sm:$0xff] }
  0x14   : > { %v528_v27 = vld [vmem:[#allocation4] sm:$0xf] }
  0x15   : > { %v541_v33 = vld [vmem:[#allocation5] sm:$0xf] }
  0x16   : > { %v514_v24 = vld [vmem:[#allocation3] sm:$0xf] }
  0x17   : > { %v501_v3 = vld.sshfl [vmem:[#allocation1] sm:$0xff pattern:$0x75316420]  ;;  %v502_v4 = vld.sshfl [vmem:[#allocation1 + $0x8] sm:$0xff pattern:$0x75316420] }
  0x18   : > { %516 = vst [vmem:[#allocation1] ss:$2 sm:$0xff] %v497_v2  ;;  %v506_v15 = vsel %vm505_vm1, %v501_v3, 0.0  ;;  %v507_v16 = vsel %vm505_vm1, %v502_v4, 0.0  ;;  %v498_v34 = vld [vmem:[#allocation2] sm:$0xf] }
  0x19   : > { %v508_v19 = vadd.f32 %v507_v16, %v506_v15 }
  0x1f   : > { %v517_v5 = vld.sshfl [vmem:[#allocation1] sm:$0xff pattern:$0x75316420]  ;;  %v518_v6 = vld.sshfl [vmem:[#allocation1 + $0x8] sm:$0xff pattern:$0x75316420] }
  0x20   : > { %529 = vst [vmem:[#allocation1] ss:$2 sm:$0xff] %v496_v0  ;;  %v521_v7 = vsel %vm505_vm1, %v517_v5, 0.0  ;;  %v522_v8 = vsel %vm505_vm1, %v518_v6, 0.0  ;;  %v704_v0 = vld [vmem:[%s1194_s6] sm:$0xff] }
  0x21   : > { %v523_v9 = vadd.f32 %v522_v8, %v521_v7  ;;  %v710_v6 = vld [vmem:[%s1195_s7] sm:$0xf] }
  0x22   : > { %v755_v7 = vld [vmem:[%s1196_s8] sm:$0xf] }
  0x23   : > { %524 = vadd.xlane.f32.xlu1 %v523_v9  ;;  %v711_v8 = vld [vmem:[%s1197_s9] sm:$0xf] }
  0x24   : > { %v756_v9 = vld [vmem:[%s1198_s10] sm:$0xf] }
  0x27   : > { %v530_v10 = vld.sshfl [vmem:[#allocation1] sm:$0xff pattern:$0x75316420]  ;;  %v531_v11 = vld.sshfl [vmem:[#allocation1 + $0x8] sm:$0xff pattern:$0x75316420] }
  0x28   : > { %v534_v12 = vsel %vm505_vm1, %v530_v10, -inf  ;;  %v535_v13 = vsel %vm505_vm1, %v531_v11, -inf  ;;  %542 = vst [vmem:[#allocation1] ss:$2 sm:$0xff] %v497_v2 }
  0x29   : > { %v536_v14 = vmax.f32 %v534_v12, %v535_v13 }
  0x2b   : > { %537 = vmax.xlane.f32.xlu0 %v536_v14 }
  0x2f   : > { %v543_v17 = vld.sshfl [vmem:[#allocation1] sm:$0xff pattern:$0x75316420]  ;;  %v544_v18 = vld.sshfl [vmem:[#allocation1 + $0x8] sm:$0xff pattern:$0x75316420] }
  0x30   : > { %v547_v20 = vsel %vm505_vm1, %v543_v17, -inf  ;;  %v548_v21 = vsel %vm505_vm1, %v544_v18, -inf }
  0x31   : > { %v549_v22 = vmax.f32 %v547_v20, %v548_v21 }
  0x33   : > { %550 = vmax.xlane.f32.xlu1 %v549_v22  ;;  %509 = vadd.xlane.f32.xlu0 %v508_v19 }
  0x96   : > { %v525_v25 = vpop.xlane.xlu1 %524 }
  0x97   : > { %v526_v26 = vadd.f32 %v525_v25, %v514_v24 }
  0x99   : > { %527 = vst.msk [vmem:[#allocation3] sm:$0xf] %vm491_vm0, %v526_v26 }
  0x9e   : > { %v538_v28 = vpop.xlane.xlu0 %537 }
  0x9f   : > { %v539_v29 = vmax.f32 %v528_v27, %v538_v28 }
  0xa0   : > { %v559_v30 = vld [vmem:[#allocation3] sm:$0xf] }
  0xa1   : > { %540 = vst.msk [vmem:[#allocation4] sm:$0xf] %vm491_vm0, %v539_v29  ;;  %v560_v31 = vmul.f32 0.00390625, %v559_v30 }
  0xa3   : > { %928 = vmatpush.msk.msra.mxu0 %vm505_vm1, %v560_v31 }
  0xa4   : > { %929 = vmatmul.msk.f32.vlgmr.msra.gmra.mxu0 %vm565_vm2, %v563_v32 }
  0xa6   : > { %v551_v35 = vpop.xlane.xlu1 %550  ;;  %v510_v36 = vpop.xlane.xlu0 %509 }
  0xa7   : > { %v552_v37 = vmax.f32 %v541_v33, %v551_v35  ;;  %v511_v38 = vadd.f32 %v510_v36, %v498_v34 }
  0xa8   : > { %v632_v40 = vld [vmem:[#allocation4] sm:$0xf] }
  0xa9   : > { %553 = vst.msk [vmem:[#allocation5] sm:$0xf] %vm491_vm0, %v552_v37  ;;  %934 = vmatpush.msk.msra.mxu2 %vm505_vm1, %v632_v40 }
  0xaa   : > { %513 = vst.msk [vmem:[#allocation2] sm:$0xf] %vm491_vm0, %v511_v38  ;;  %935 = vmatmul.msk.f32.vlgmr.msra.gmra.mxu2 %vm565_vm2, %v630_v39 }
  0xac   : > { %930 = vmatmul.msk.f32.gmra.mxu0 %vm565_vm2, %v564_v41 }
  0xb0   : > { %v669_v44 = vld [vmem:[#allocation5] sm:$0xf] }
  0xb1   : > { %937 = vmatpush.msk.msra.mxu3 %vm505_vm1, %v669_v44  ;;  %v557_v45 = vld [vmem:[#allocation2] sm:$0xf] }
  0xb2   : > { %938 = vmatmul.msk.f32.vlgmr.msra.gmra.mxu3 %vm565_vm2, %v667_v42  ;;  %v558_v46 = vmul.f32 0.00390625, %v557_v45  ;;  %936 = vmatmul.msk.f32.gmra.mxu2 %vm565_vm2, %v631_v43 }
  0xb4   : > { %931 = vmatpush.msk.msra.mxu1 %vm505_vm1, %v558_v46 }
  0xb5   : > { %932 = vmatmul.msk.f32.vlgmr.msra.gmra.mxu1 %vm565_vm2, %v561_v47 }
  0xba   : > { %939 = vmatmul.msk.f32.gmra.mxu3 %vm565_vm2, %v668_v48 }
  0xbd   : > { %933 = vmatmul.msk.f32.gmra.mxu1 %vm565_vm2, %v562_v49 }
 0x121   : > { %v592_v50 = vpop.f32.mrf.mxu0 }
 0x129   : > { %v595_v55 = vpop.f32.mrf.mxu0 }
 0x12d   : > { %v659_v51 = vpop.f32.mrf.mxu2 }
 0x132   : > { %v624_v52 = vpop.f32.mrf.mxu1 }
 0x133   : > { %v625_v53 = vadd.f32 %v624_v52, %v592_v50 }
 0x135   : > { %v696_v54 = vpop.f32.mrf.mxu3  ;;  %v665_v56 = vadd.f32 %v659_v51, %v625_v53  ;;  %v662_v58 = vpop.f32.mrf.mxu2 }
 0x137   : > { %v702_v60 = vadd.f32 %v696_v54, %v665_v56 }
 0x139   : > { %v706_v3 = vadd.f32 %v704_v0, %v702_v60 }
 0x13a   : > { %v627_v57 = vpop.f32.mrf.mxu1 }
 0x13b   : > { %v628_v59 = vadd.f32 %v627_v57, %v595_v55  ;;  %v708_v5 = vmax.f32 %v706_v3, 0.0 }
 0x13d   : > { %v666_v61 = vadd.f32 %v662_v58, %v628_v59  ;;  %v699_v62 = vpop.f32.mrf.mxu3 }
 0x13f   : > { %v703_v1 = vadd.f32 %v699_v62, %v666_v61 }
 0x141   : > { %v707_v2 = vadd.f32 %v705_v63, %v703_v1 }
 0x143   : > { %v709_v4 = vmax.f32 %v707_v2, 0.0 }
 0x145   : > { %730 = vmatpush.msrb.mxu0 %v709_v4  ;;  %774 = vmatpush.msrb.mxu1 %v709_v4 }
 0x147   : > { %731 = vmatpush.msrb.mxu0 %v708_v5  ;;  %775 = vmatpush.msrb.mxu1 %v708_v5 }
 0x148   : > { %940 = vmatmul.msk.f32.vlgmr.msrb.gmra.mxu0 %vm712_vm3, %v710_v6  ;;  %942 = vmatmul.msk.f32.vlgmr.msrb.gmra.mxu1 %vm712_vm3, %v755_v7 }
 0x1c5   : > { %v733_v10 = vpop.f32.mrf.mxu0  ;;  %v777_v11 = vpop.f32.mrf.mxu1 }
 0x1c6   : > { %v734_v12 = vadd.f32 %v733_v10, %v711_v8  ;;  %v778_v13 = vadd.f32 %v777_v11, %v756_v9 }
 0x1c8   : > { %v941_v14 = vmul.f32 -1.442695, %v734_v12  ;;  %v943_v15 = vmul.f32 -1.442695, %v778_v13 }
 0x1ca   : > { %974 = vpow2.f32 %v941_v14 }
 0x1cb   : > { %976 = vpow2.f32 %v943_v15 }
 0x1d0   : > { %v975_v16 = vpop.eup %974 }
 0x1d1   : > { %v977_v17 = vpop.eup %976  ;;  %v739_v18 = vadd.f32 1.0, %v975_v16 }
 0x1d2   : > { %v783_v19 = vadd.f32 1.0, %v977_v17 }
 0x1d3   : > { %978 = vrcp.f32 %v739_v18  ;;  %v751_v25 = vand.u32 2147483648, %v739_v18  ;;  %v749_v28 = vand.u32 2147483647, %v739_v18  ;;  %vm745_vm6 = vweird.f32 %v739_v18 }
 0x1d4   : > { %980 = vrcp.f32 %v783_v19  ;;  %v795_v29 = vand.u32 2147483648, %v783_v19  ;;  %v793_v31 = vand.u32 2147483647, %v783_v19  ;;  %vm789_vm8 = vweird.f32 %v783_v19 }
 0x1d5   : > { %v752_v33 = vor.u32 1.1754944e-38, %v751_v25  ;;  %vm750_vm9 = vcmp.eq.f32.partialorder %v749_v28, 8.507059e+37 }
 0x1d6   : > { %v796_v36 = vor.u32 1.1754944e-38, %v795_v29  ;;  %vm794_vm11 = vcmp.eq.f32.partialorder %v793_v31, 8.507059e+37 }
 0x1d9   : > { %v979_v20 = vpop.eup %978 }
 0x1da   : > { %v981_v21 = vpop.eup %980  ;;  %v741_v22 = vmul.f32 %v979_v20, %v739_v18  ;;  %vm746_vm4 = vweird.f32 %v979_v20 }
 0x1db   : > { %v785_v23 = vmul.f32 %v981_v21, %v783_v19  ;;  %vm790_vm5 = vweird.f32 %v981_v21  ;;  %vm747_vm7 = vmor %vm745_vm6, %vm746_vm4 }
 0x1dc   : > { %v742_v24 = vsub.f32 1.0, %v741_v22  ;;  %vm791_vm10 = vmor %vm789_vm8, %vm790_vm5 }
 0x1dd   : > { %v786_v26 = vsub.f32 1.0, %v785_v23 }
 0x1de   : > { %v743_v27 = vmul.f32 %v979_v20, %v742_v24 }
 0x1df   : > { %v787_v30 = vmul.f32 %v981_v21, %v786_v26 }
 0x1e0   : > { %v744_v32 = vadd.f32 %v979_v20, %v743_v27 }
 0x1e1   : > { %v788_v34 = vadd.f32 %v981_v21, %v787_v30 }
 0x1e2   : > { %v748_v35 = vsel %vm747_vm7, %v979_v20, %v744_v32 }
 0x1e3   : > { %v753_v37 = vsel %vm750_vm9, %v752_v33, %v748_v35  ;;  %v792_v38 = vsel %vm791_vm10, %v981_v21, %v788_v34 }
 0x1e4   : > { %799 = vst.msk [vmem:[%s482_s17] sm:$0xf] %vm491_vm0, %v753_v37  ;;  %v797_v39 = vsel %vm794_vm11, %v796_v36, %v792_v38 }
 0x1e5   : > { %800 = vst.msk [vmem:[%s486_s19] sm:$0xf] %vm491_vm0, %v797_v39 }
 0x1e6 PF: > { %s23_s23 = sadd.s32 1, %s1004_s23   ;;  %s1201_s21 = smov %s1000_s22 }
 0x1e7   : > { %p20_p5 = scmp.ge.s32.totalorder %s23_s23, 4   ;;  %s1202_s22 = smov %s1204_s24 }
 0x1e9   :  { %22 = sbr.rel (!%p20_p5) target bundleno = 2 (0x2), region = 117 }

</bundles_post_ra>
